<compile_context>
chip_gen: v7x
topology: tpu7x:2x2x1
jax: 0.10.0
libtpu: 0.0.40
codegen_flags: <defaults>
</compile_context>

<pallas_src>
import jax
import jax.numpy as jnp
from jax.experimental import pallas as pl
from jax.experimental.pallas import tpu as pltpu

_LANE = 128      # vreg lane width (last dim)
_SUBLANE = 8     # vreg sublane width (second-to-last dim)


def _round_up(v, m):
    return ((v + m - 1) // m) * m


def _make_fused_kernel(n_hidden, n_real_nodes, adj_first, use_bf16):
    """Build the fused GCNFA forward kernel body.

    n_hidden     : number of hidden GraphConv layers (bias-free + ReLU).
    n_real_nodes : unpadded node count (mean augmentation divides by this).
    adj_first    : per hidden layer, compute (adj @ x) @ W if True else adj @ (x @ W).
    use_bf16     : cast MXU operands to bf16 (f32 accumulation on the MXU).
    """
    mxu_dtype = jnp.bfloat16 if use_bf16 else jnp.float32
    inv_n = 1.0 / float(n_real_nodes)

    def dot(a, b):
        # operands already in mxu_dtype; accumulate in f32
        return jnp.dot(a, b, preferred_element_type=jnp.float32)

    def kernel(*refs):
        # refs = (x, adj, w_0..w_{n_hidden-1}, lin_w, lin_b, out)
        x_ref, adj_ref = refs[0], refs[1]
        w_refs = refs[2:2 + n_hidden]
        wl_ref = refs[2 + n_hidden]
        b_ref = refs[3 + n_hidden]
        o_ref = refs[4 + n_hidden]

        # adj loaded + cast once, reused by every layer (stays VMEM/vreg resident).
        adj = adj_ref[...].astype(mxu_dtype)
        h = x_ref[...]

        # Hidden GraphConv layers: relu(adj @ (x @ W)); dropout is identity in eval.
        for i in range(n_hidden):
            w = w_refs[i][...].astype(mxu_dtype)
            hc = h.astype(mxu_dtype)
            if adj_first[i]:
                h = dot(dot(adj, hc).astype(mxu_dtype), w)
            else:
                h = dot(adj, dot(hc, w).astype(mxu_dtype))
            h = jnp.maximum(h, 0.0)          # VPU

        # Feature augmentation: x + mean over nodes, broadcast to every row.
        # Padded node rows of h are exactly zero (their adj rows are zero), so the sum
        # over the padded slab equals the sum over real rows; divide by the real count.
        h = h + jnp.sum(h, axis=0, keepdims=True) * inv_n   # XLU cross-sublane reduce

        # Final GraphConv with bias (n_classes <= n_hid, so contract features first).
        hw = dot(h.astype(mxu_dtype), wl_ref[...].astype(mxu_dtype)).astype(mxu_dtype)
        out = dot(adj, hw)
        o_ref[...] = (out + b_ref[...]).astype(o_ref.dtype)

    return kernel


def gcnfa_forward(x, adj, hidden_weights, lin_w, lin_b, *, use_bf16_mxu=False):
    """Fused GCNFA forward.  x:[N,F], adj:[N,N], weights [F_in,F_out], lin_b:(C,)/(1,C)."""
    n, n_feat = x.shape
    n_classes = lin_w.shape[1]
    # N is the lane axis of adj and the MXU contraction axis of adj @ h -> pad to 128.
    n_pad = _round_up(n, _LANE)

    def pad2(a, rows, cols):
        return jnp.pad(a, ((0, rows - a.shape[0]), (0, cols - a.shape[1])))

    x_p = pad2(x.astype(jnp.float32), n_pad, _round_up(n_feat, _LANE))
    adj_p = pad2(adj.astype(jnp.float32), n_pad, n_pad)

    w_ps, adj_first = [], []
    for w in hidden_weights:
        f_in, f_out = w.shape
        adj_first.append(f_in <= f_out)   # contract the smaller feature dim with adj
        w_ps.append(pad2(w.astype(jnp.float32),
                         _round_up(f_in, _LANE), _round_up(f_out, _LANE)))

    lin_w_p = pad2(lin_w.astype(jnp.float32),
                   _round_up(lin_w.shape[0], _LANE), _round_up(n_classes, _LANE))
    lin_b_p = pad2(lin_b.reshape(1, -1).astype(jnp.float32),
                   1, _round_up(n_classes, _LANE))

    kernel = _make_fused_kernel(len(hidden_weights), n, tuple(adj_first), use_bf16_mxu)

    inputs = (x_p, adj_p, *w_ps, lin_w_p, lin_b_p)
    out_shape = jax.ShapeDtypeStruct((n_pad, lin_w_p.shape[1]), jnp.float32)

    # Advisory cost estimate (padded-shape matmul flops) + VMEM budget sized to fit.
    flops = 0
    f_cur = x_p.shape[1]
    for w_p, afirst in zip(w_ps, adj_first):
        f_in, f_out = w_p.shape
        if afirst:
            flops += 2 * n_pad * n_pad * f_in + 2 * n_pad * f_in * f_out
        else:
            flops += 2 * n_pad * f_in * f_out + 2 * n_pad * n_pad * f_out
        f_cur = f_out
    flops += 2 * n_pad * f_cur * lin_w_p.shape[1] + 2 * n_pad * n_pad * lin_w_p.shape[1]
    bytes_accessed = sum(int(a.size) * 4 for a in inputs) + n_pad * lin_w_p.shape[1] * 4

    vmem_need = bytes_accessed + 3 * n_pad * max(a.shape[1] for a in (x_p, *w_ps)) * 4
    vmem_limit = int(min(max(2 * vmem_need, 16 * 2 ** 20), 64 * 2 ** 20))

    out_p = pl.pallas_call(
        kernel,
        out_shape=out_shape,
        in_specs=[pl.BlockSpec(memory_space=pltpu.MemorySpace.VMEM)] * len(inputs),
        out_specs=pl.BlockSpec(memory_space=pltpu.MemorySpace.VMEM),
        compiler_params=pltpu.CompilerParams(vmem_limit_bytes=vmem_limit),
        cost_estimate=pl.CostEstimate(flops=flops, transcendentals=0,
                                      bytes_accessed=bytes_accessed),
    )(*inputs)

    # Slice the lane-dense padded slab back to the logical output shape.
    return out_p[:n, :n_classes]


def gcnfa_reference(x, adj, hidden_weights, lin_w, lin_b):
    # pure-JAX reference for correctness checking
    for w in hidden_weights:
        x = jnp.maximum(adj @ (x @ w), 0.0)
    x = x + jnp.mean(x, axis=0, keepdims=True)
    return adj @ (x @ lin_w) + lin_b.reshape(1, -1)


if __name__ == "__main__":
    # args: n_layers=3, n_feat=16, n_hid=32, n_classes=8, dropout1 (eval => identity)
    n_layers, n_feat, n_hid, n_classes = 3, 16, 32, 8
    n_nodes = 32

    key = jax.random.PRNGKey(0)
    k_x, k_adj, k_w0, k_w1, k_wl, k_bl = jax.random.split(key, 6)

    x = jax.random.normal(k_x, (n_nodes, n_feat), dtype=jnp.float32)

    # symmetric row-normalized adjacency (with self loops)
    a = jax.random.uniform(k_adj, (n_nodes, n_nodes), dtype=jnp.float32)
    a = (a + a.T) * 0.5 + jnp.eye(n_nodes, dtype=jnp.float32)
    adj = a / jnp.sum(a, axis=1, keepdims=True)

    def glorot(k, fan_in, fan_out):
        scale = (6.0 / (fan_in + fan_out)) ** 0.5
        return jax.random.uniform(
            k, (fan_in, fan_out), dtype=jnp.float32, minval=-scale, maxval=scale)

    hidden_weights = [
        glorot(k_w0, n_feat, n_hid),   # GraphConv(n_feat, n_hid, bias=False)
        glorot(k_w1, n_hid, n_hid),    # GraphConv(n_hid, n_hid, bias=False)
    ]
    lin_w = glorot(k_wl, n_hid, n_classes)               # GraphConv(n_hid, n_classes)
    lin_b = jax.random.uniform(
        k_bl, (1, n_classes), dtype=jnp.float32, minval=-0.1, maxval=0.1)

    ref = gcnfa_reference(x, adj, hidden_weights, lin_w, lin_b)

    # f32-MXU path (default): tight tolerance against the f32 reference.
    out = gcnfa_forward(x, adj, hidden_weights, lin_w, lin_b)
    out = jax.block_until_ready(out)
    assert out.shape == (n_nodes, n_classes)
    assert jnp.allclose(out, ref, atol=1e-4, rtol=1e-4)

    # bf16-MXU path (v6e/v7x-native operands, f32 accumulation): looser tolerance.
    out_bf16 = gcnfa_forward(x, adj, hidden_weights, lin_w, lin_b, use_bf16_mxu=True)
    out_bf16 = jax.block_until_ready(out_bf16)
    assert out_bf16.shape == (n_nodes, n_classes)
    assert jnp.allclose(out_bf16, ref, atol=5e-2, rtol=5e-2)

    # TODO(synk): dropout is treated as identity (eval-mode forward); training-mode
    # stochastic masking would use pltpu.prng_seed / pltpu.stateful_bernoulli.
    print("KERNEL_OK")
</pallas_src>

<mosaic_0001>
module attributes {stable_mosaic.version = 11 : i64} {
  func.func @kernel(%arg0: memref<128x128xf32, #tpu.memory_space<vmem>>, %arg1: memref<128x128xf32, #tpu.memory_space<vmem>>, %arg2: memref<128x128xf32, #tpu.memory_space<vmem>>, %arg3: memref<128x128xf32, #tpu.memory_space<vmem>>, %arg4: memref<128x128xf32, #tpu.memory_space<vmem>>, %arg5: memref<1x128xf32, #tpu.memory_space<vmem>>, %arg6: memref<128x128xf32, #tpu.memory_space<vmem>>) attributes {dimension_semantics = [], scalar_prefetch = 0 : i64, scratch_operands = 0 : i64, tpu.core_type = #tpu.core_type<tc>} {
    %c0 = arith.constant 0 : index
    %c0_0 = arith.constant 0 : index
    %0 = vector.load %arg1[%c0, %c0_0] : memref<128x128xf32, #tpu.memory_space<vmem>>, vector<128x128xf32>
    %c0_1 = arith.constant 0 : index
    %c0_2 = arith.constant 0 : index
    %1 = vector.load %arg0[%c0_1, %c0_2] : memref<128x128xf32, #tpu.memory_space<vmem>>, vector<128x128xf32>
    %c0_3 = arith.constant 0 : index
    %c0_4 = arith.constant 0 : index
    %2 = vector.load %arg2[%c0_3, %c0_4] : memref<128x128xf32, #tpu.memory_space<vmem>>, vector<128x128xf32>
    %cst = arith.constant dense<0.000000e+00> : vector<128x128xf32>
    %3 = tpu.matmul %0, %1, %cst {dimension_numbers = #tpu.dot_dimension_numbers<[1], [0], [0], [1], [0, 0, 1, 1], [], []>} : vector<128x128xf32>, vector<128x128xf32>, vector<128x128xf32> -> vector<128x128xf32>
    %cst_5 = arith.constant dense<0.000000e+00> : vector<128x128xf32>
    %4 = tpu.matmul %3, %2, %cst_5 {dimension_numbers = #tpu.dot_dimension_numbers<[1], [0], [0], [1], [0, 0, 1, 1], [], []>} : vector<128x128xf32>, vector<128x128xf32>, vector<128x128xf32> -> vector<128x128xf32>
    %cst_6 = arith.constant 0.000000e+00 : f32
    %5 = vector.broadcast %cst_6 : f32 to vector<128x128xf32>
    %6 = arith.maximumf %4, %5 : vector<128x128xf32>
    %c0_7 = arith.constant 0 : index
    %c0_8 = arith.constant 0 : index
    %7 = vector.load %arg3[%c0_7, %c0_8] : memref<128x128xf32, #tpu.memory_space<vmem>>, vector<128x128xf32>
    %cst_9 = arith.constant dense<0.000000e+00> : vector<128x128xf32>
    %8 = tpu.matmul %0, %6, %cst_9 {dimension_numbers = #tpu.dot_dimension_numbers<[1], [0], [0], [1], [0, 0, 1, 1], [], []>} : vector<128x128xf32>, vector<128x128xf32>, vector<128x128xf32> -> vector<128x128xf32>
    %cst_10 = arith.constant dense<0.000000e+00> : vector<128x128xf32>
    %9 = tpu.matmul %8, %7, %cst_10 {dimension_numbers = #tpu.dot_dimension_numbers<[1], [0], [0], [1], [0, 0, 1, 1], [], []>} : vector<128x128xf32>, vector<128x128xf32>, vector<128x128xf32> -> vector<128x128xf32>
    %cst_11 = arith.constant 0.000000e+00 : f32
    %10 = vector.broadcast %cst_11 : f32 to vector<128x128xf32>
    %11 = arith.maximumf %9, %10 : vector<128x128xf32>
    %cst_12 = arith.constant dense<0.000000e+00> : vector<128xf32>
    %12 = vector.multi_reduction <add>, %11, %cst_12 [0] : vector<128x128xf32> to vector<128xf32>
    %13 = vector.shape_cast %12 : vector<128xf32> to vector<1x128xf32>
    %cst_13 = arith.constant 3.125000e-02 : f32
    %14 = vector.broadcast %cst_13 : f32 to vector<1x128xf32>
    %15 = arith.mulf %13, %14 : vector<1x128xf32>
    %16 = vector.broadcast %15 : vector<1x128xf32> to vector<128x128xf32>
    %17 = arith.addf %11, %16 : vector<128x128xf32>
    %c0_14 = arith.constant 0 : index
    %c0_15 = arith.constant 0 : index
    %18 = vector.load %arg4[%c0_14, %c0_15] : memref<128x128xf32, #tpu.memory_space<vmem>>, vector<128x128xf32>
    %cst_16 = arith.constant dense<0.000000e+00> : vector<128x128xf32>
    %19 = tpu.matmul %17, %18, %cst_16 {dimension_numbers = #tpu.dot_dimension_numbers<[1], [0], [0], [1], [0, 0, 1, 1], [], []>} : vector<128x128xf32>, vector<128x128xf32>, vector<128x128xf32> -> vector<128x128xf32>
    %cst_17 = arith.constant dense<0.000000e+00> : vector<128x128xf32>
    %20 = tpu.matmul %0, %19, %cst_17 {dimension_numbers = #tpu.dot_dimension_numbers<[1], [0], [0], [1], [0, 0, 1, 1], [], []>} : vector<128x128xf32>, vector<128x128xf32>, vector<128x128xf32> -> vector<128x128xf32>
    %c0_18 = arith.constant 0 : index
    %c0_19 = arith.constant 0 : index
    %21 = vector.load %arg5[%c0_18, %c0_19] : memref<1x128xf32, #tpu.memory_space<vmem>>, vector<1x128xf32>
    %22 = vector.broadcast %21 : vector<1x128xf32> to vector<128x128xf32>
    %23 = arith.addf %20, %22 : vector<128x128xf32>
    %c0_20 = arith.constant 0 : index
    %c0_21 = arith.constant 0 : index
    %24 = vector.load %arg6[%c0_20, %c0_21] : memref<128x128xf32, #tpu.memory_space<vmem>>, vector<128x128xf32>
    tpu.vector_store %arg6[%c0_20, %c0_21], %23 {strides = array<i32>} : memref<128x128xf32, #tpu.memory_space<vmem>>, vector<128x128xf32>,
    return
  }
}

</mosaic_0001>

<bundles_post_ra>
// kernel: tpu_custom_call.1
= control target key start
LH: loop header
LB: loop body
LE: loop exit
PB: predicated region body
PF: predicated region fallthrough
CT: control target
= control target key end

     0   :  { %11 = vsyncpa [#allocation3], 0  ;;  %s2253_s0 = inlined_call_operand.hbm [shape: f32[128,128], index: 0, kind: input, shape index: {}]   ;;  %s2254_s1 = inlined_call_operand.hbm [shape: f32[128,128], index: 1, kind: input, shape index: {}]   ;;  %s2255_s2 = inlined_call_operand.hbm [shape: f32[128,128], index: 2, kind: input, shape index: {}]   ;;  %s2256_s3 = inlined_call_operand.hbm [shape: f32[128,128], index: 3, kind: input, shape index: {}]   ;;  %s2257_s4 = inlined_call_operand.hbm [shape: f32[128,128], index: 4, kind: input, shape index: {}]   ;;  %s2258_s5 = inlined_call_operand.vmem [shape: f32[1,128], index: 5, kind: input, shape index: {}]   ;;  %s2259_s6 = inlined_call_operand.hbm [shape: f32[128,128], index: 6, kind: output, shape index: {}]  }
   0x1   :  { %12 = vsyncpa [#allocation6], 0 }
   0x2   :  { %13 = vsyncpa [#allocation9], 0 }
   0x3   :  { %14 = vsyncpa [#allocation4], 0  ;;  %s2023_s21 = smov [#allocation5]   ;;  %s2024_s23 = smov [#allocation8]  }
   0x4   :  { %s32_s22 = sshll.u32 %s2023_s21, 4  ;;  %s56_s24 = sshll.u32 %s2024_s23, 4  ;;  %s33_s22 = int_to_ptr.vmem [resolvable:$true] %s32_s22  ;;  %s2066_s24 = int_to_ptr.vmem [resolvable:$true] %s56_s24 }
   0x5   :  { %s1883_s27 = scalar_lea.hbm %s2254_s1, 2048 }
   0x6   :  { %p1884_p0 = scmp.ne.s32.totalorder %s2254_s1, %s1883_s27  ;;  %p1887_p1 = scmp.lt.u32.totalorder %s1883_s27, %s2254_s1 }
   0x8   :  { %p1889_p2 = pnand %p1887_p1, %p1884_p0 }
   0xa   :  { %1892 = shalt.err (!%p1889_p2)
}
   0xb   :  { %s1893_s8 = scalar_lea.vmem %s33_s22, 2048  ;;  %p1898_p4 = scmp.lt.s32.totalorder %s33_s22, %s33_s22 }
   0xc   :  { %p1894_p3 = scmp.ne.s32.totalorder %s33_s22, %s1893_s8  ;;  %p1899_p5 = scmp.lt.s32.totalorder %s1893_s8, %s1893_s8 }
   0xe   :  { %p1900_p6 = por %p1899_p5, %p1898_p4 }
  0x10   :  { %p1901_p7 = pnand %p1900_p6, %p1894_p3 }
  0x12   :  { %1904 = shalt.err (!%p1901_p7)
}
  0x13   :  { %s2025_s9 = smov 128   ;;  %s2026_s10 = smov 8  }
  0x14   :  { %38 = dma.hbm_to_vmem [thread:$0]  %s2254_s1, 2048, %s33_s22, [#allocation6], %s2025_s9, %s2025_s9, %s2026_s10  }
  0x15   :  { %s1905_s15 = scalar_lea.hbm %s2256_s3, 2048 }
  0x16   :  { %p1906_p8 = scmp.ne.s32.totalorder %s2256_s3, %s1905_s15  ;;  %p1909_p9 = scmp.lt.u32.totalorder %s1905_s15, %s2256_s3 }
  0x18   :  { %p1911_p10 = pnand %p1909_p9, %p1906_p8 }
  0x1a   :  { %1914 = shalt.err (!%p1911_p10)
}
  0x1b   :  { %s1915_s20 = scalar_lea.vmem %s2066_s24, 2048  ;;  %p1920_p12 = scmp.lt.s32.totalorder %s2066_s24, %s2066_s24 }
  0x1c   :  { %p1916_p11 = scmp.ne.s32.totalorder %s2066_s24, %s1915_s20  ;;  %p1921_p13 = scmp.lt.s32.totalorder %s1915_s20, %s1915_s20 }
  0x1e   :  { %p1922_p0 = por %p1921_p13, %p1920_p12 }
  0x20   :  { %p1923_p1 = pnand %p1922_p0, %p1916_p11 }
  0x22   :  { %1926 = shalt.err (!%p1923_p1)
}
  0x23   :  { %62 = dma.hbm_to_vmem [thread:$0]  %s2256_s3, 2048, %s2066_s24, [#allocation9], %s2025_s9, %s2025_s9, %s2026_s10  }
  0x24   :  { %s2027_s22 = smov [#allocation2]   ;;  %s2028_s25 = smov [#allocation7]  }
  0x25   :  { %s20_s23 = sshll.u32 %s2027_s22, 4  ;;  %s44_s26 = sshll.u32 %s2028_s25, 4  ;;  %s21_s23 = int_to_ptr.vmem [resolvable:$true] %s20_s23  ;;  %s2103_s26 = int_to_ptr.vmem [resolvable:$true] %s44_s26 }
  0x26   :  { %s1927_s29 = scalar_lea.hbm %s2253_s0, 2048 }
  0x27   :  { %p1928_p2 = scmp.ne.s32.totalorder %s2253_s0, %s1927_s29  ;;  %p1931_p3 = scmp.lt.u32.totalorder %s1927_s29, %s2253_s0 }
  0x29   :  { %p1933_p4 = pnand %p1931_p3, %p1928_p2 }
  0x2b   :  { %1936 = shalt.err (!%p1933_p4)
}
  0x2c   :  { %s1937_s3 = scalar_lea.vmem %s21_s23, 2048  ;;  %p1942_p6 = scmp.lt.s32.totalorder %s21_s23, %s21_s23 }
  0x2d   :  { %p1938_p5 = scmp.ne.s32.totalorder %s21_s23, %s1937_s3  ;;  %p1943_p7 = scmp.lt.s32.totalorder %s1937_s3, %s1937_s3 }
  0x2f   :  { %p1944_p8 = por %p1943_p7, %p1942_p6 }
  0x31   :  { %p1945_p9 = pnand %p1944_p8, %p1938_p5 }
  0x33   :  { %1948 = shalt.err (!%p1945_p9)
}
  0x34   :  { %26 = dma.hbm_to_vmem [thread:$0]  %s2253_s0, 2048, %s21_s23, [#allocation3], %s2025_s9, %s2025_s9, %s2026_s10  }
  0x35   :  { %s1949_s15 = scalar_lea.hbm %s2255_s2, 2048 }
  0x36   :  { %p1950_p10 = scmp.ne.s32.totalorder %s2255_s2, %s1949_s15  ;;  %p1953_p11 = scmp.lt.u32.totalorder %s1949_s15, %s2255_s2 }
  0x38   :  { %p1955_p12 = pnand %p1953_p11, %p1950_p10 }
  0x3a   :  { %1958 = shalt.err (!%p1955_p12)
}
  0x3b   :  { %s1959_s20 = scalar_lea.vmem %s2103_s26, 2048  ;;  %p1964_p0 = scmp.lt.s32.totalorder %s2103_s26, %s2103_s26 }
  0x3c   :  { %p1960_p13 = scmp.ne.s32.totalorder %s2103_s26, %s1959_s20  ;;  %p1965_p1 = scmp.lt.s32.totalorder %s1959_s20, %s1959_s20 }
  0x3e   :  { %p1966_p2 = por %p1965_p1, %p1964_p0 }
  0x40   :  { %p1967_p3 = pnand %p1966_p2, %p1960_p13 }
  0x42   :  { %1970 = shalt.err (!%p1967_p3)
}
  0x43   :  { %50 = dma.hbm_to_vmem [thread:$0]  %s2255_s2, 2048, %s2103_s26, [#allocation6], %s2025_s9, %s2025_s9, %s2026_s10  }
  0x44   :  { %s2029_s21 = smov [#allocation10]   ;;  %s1971_s27 = scalar_lea.hbm %s2257_s4, 2048 }
  0x45   :  { %s68_s22 = sshll.u32 %s2029_s21, 4  ;;  %p1972_p4 = scmp.ne.s32.totalorder %s2257_s4, %s1971_s27  ;;  %s69_s22 = int_to_ptr.vmem [resolvable:$true] %s68_s22 }
  0x46   :  { %p1975_p5 = scmp.lt.u32.totalorder %s1971_s27, %s2257_s4 }
  0x48   :  { %p1977_p6 = pnand %p1975_p5, %p1972_p4 }
  0x4a   :  { %1980 = shalt.err (!%p1977_p6)
}
  0x4b   :  { %s1981_s8 = scalar_lea.vmem %s69_s22, 2048  ;;  %p1986_p8 = scmp.lt.s32.totalorder %s69_s22, %s69_s22 }
  0x4c   :  { %p1982_p7 = scmp.ne.s32.totalorder %s69_s22, %s1981_s8  ;;  %p1987_p9 = scmp.lt.s32.totalorder %s1981_s8, %s1981_s8 }
  0x4e   :  { %p1988_p10 = por %p1987_p9, %p1986_p8 }
  0x50   :  { %p1989_p11 = pnand %p1988_p10, %p1982_p7 }
  0x52   :  { %1992 = shalt.err (!%p1989_p11)
}
  0x53   :  { %74 = dma.hbm_to_vmem [thread:$0]  %s2257_s4, 2048, %s69_s22, [#allocation9], %s2025_s9, %s2025_s9, %s2026_s10  }
  0x54   :  { %2015 = dma.done.wait [#allocation3], 2048  }
  0x55   :  { %2016 = vsyncadd [#allocation3], 4294965248 }
  0x56   :  { %2017 = dma.done.wait [#allocation6], 4096  }
  0x57   :  { %2018 = vsyncadd [#allocation6], 4294963200 }
  0x58   :  { %2019 = dma.done.wait [#allocation9], 4096  }
  0x59   :  { %2020 = vsyncadd [#allocation9], 4294963200  ;;  %v108_v0 = vld [vmem:[#allocation2] sm:$0xff]  ;;  %v109_v1 = vld [vmem:[#allocation2 + $0x8] sm:$0xff] }
  0x5a   :  { %v110_v2 = vld [vmem:[#allocation2 + $0x10] sm:$0xff]  ;;  %v1683_v3 = vpack.c.bf16 %v109_v1, %v108_v0  ;;  %v111_v4 = vld [vmem:[#allocation2 + $0x18] sm:$0xff]  ;;  %v112_v6 = vld [vmem:[#allocation2 + $0x20] sm:$0xff] }
  0x5b   :  { %v1687_v5 = vpack.c.bf16 %v111_v4, %v110_v2  ;;  %v113_v7 = vld [vmem:[#allocation2 + $0x28] sm:$0xff]  ;;  %v2155_v9 = vld [vmem:[#allocation5] sm:$0xff]  ;;  %v114_v10 = vld [vmem:[#allocation2 + $0x30] sm:$0xff] }
  0x5c   :  { %1684 = vmatprep.subr.bf16.mxu0 %v1683_v3  ;;  %v1691_v8 = vpack.c.bf16 %v113_v7, %v112_v6  ;;  %v115_v11 = vld [vmem:[#allocation2 + $0x38] sm:$0xff]  ;;  %1379 = vmatprep.mubr.f32.mxu0 %v2155_v9  ;;  %v116_v13 = vld [vmem:[#allocation2 + $0x40] sm:$0xff]  ;;  %v117_v14 = vld [vmem:[#allocation2 + $0x48] sm:$0xff] }
  0x5d   :  { %1686 = vmatpush3.bf16.msra.mxu0 %v1683_v3  ;;  %v1695_v12 = vpack.c.bf16 %v115_v11, %v114_v10  ;;  %v124_v15 = vld [vmem:[#allocation7] sm:$0xff]  ;;  %v125_v16 = vld [vmem:[#allocation7 + $0x8] sm:$0xff]  ;;  %v126_v17 = vld [vmem:[#allocation7 + $0x10] sm:$0xff]  ;;  %v1699_v21 = vpack.c.bf16 %v117_v14, %v116_v13 }
  0x5e   :  { %1688 = vmatprep.subr.bf16.mxu0 %v1687_v5  ;;  %v127_v18 = vld [vmem:[#allocation7 + $0x18] sm:$0xff]  ;;  %v1715_v19 = vpack.c.bf16 %v125_v16, %v124_v15  ;;  %v128_v22 = vld [vmem:[#allocation7 + $0x20] sm:$0xff]  ;;  %v129_v23 = vld [vmem:[#allocation7 + $0x28] sm:$0xff] }
  0x5f   :  { %v1719_v20 = vpack.c.bf16 %v127_v18, %v126_v17  ;;  %v118_v24 = vld [vmem:[#allocation2 + $0x50] sm:$0xff]  ;;  %v119_v25 = vld [vmem:[#allocation2 + $0x58] sm:$0xff]  ;;  %v1723_v26 = vpack.c.bf16 %v129_v23, %v128_v22  ;;  %v120_v30 = vld [vmem:[#allocation2 + $0x60] sm:$0xff] }
  0x60   :  { %1716 = vmatprep.subr.bf16.mxu1 %v1715_v19  ;;  %v1703_v27 = vpack.c.bf16 %v119_v25, %v118_v24  ;;  %v130_v28 = vld [vmem:[#allocation7 + $0x30] sm:$0xff]  ;;  %v131_v29 = vld [vmem:[#allocation7 + $0x38] sm:$0xff]  ;;  %v121_v31 = vld [vmem:[#allocation2 + $0x68] sm:$0xff] }
  0x61   :  { %1690 = vmatpush3.bf16.msra.mxu0 %v1687_v5  ;;  %1718 = vmatpush3.bf16.msra.mxu1 %v1715_v19  ;;  %v1727_v32 = vpack.c.bf16 %v131_v29, %v130_v28  ;;  %v1707_v33 = vpack.c.bf16 %v121_v31, %v120_v30  ;;  %v132_v34 = vld [vmem:[#allocation7 + $0x40] sm:$0xff]  ;;  %v133_v35 = vld [vmem:[#allocation7 + $0x48] sm:$0xff]  ;;  %v122_v36 = vld [vmem:[#allocation2 + $0x70] sm:$0xff] }
  0x62   :  { %1692 = vmatprep.subr.bf16.mxu0 %v1691_v8  ;;  %1720 = vmatprep.subr.bf16.mxu1 %v1719_v20  ;;  %v123_v37 = vld [vmem:[#allocation2 + $0x78] sm:$0xff]  ;;  %v1731_v38 = vpack.c.bf16 %v133_v35, %v132_v34  ;;  %v134_v40 = vld [vmem:[#allocation7 + $0x50] sm:$0xff]  ;;  %v136_v43 = vld [vmem:[#allocation7 + $0x60] sm:$0xff] }
  0x63   :  { %v1711_v39 = vpack.c.bf16 %v123_v37, %v122_v36  ;;  %v135_v41 = vld [vmem:[#allocation7 + $0x58] sm:$0xff]  ;;  %v137_v44 = vld [vmem:[#allocation7 + $0x68] sm:$0xff]  ;;  %v2160_v47 = vld [vmem:[#allocation5 + $0x10] sm:$0xff] }
  0x64   :  { %v1735_v42 = vpack.c.bf16 %v135_v41, %v134_v40  ;;  %v2158_v45 = vld [vmem:[#allocation5 + $0x8] sm:$0xff]  ;;  %v1739_v46 = vpack.c.bf16 %v137_v44, %v136_v43  ;;  %v138_v48 = vld [vmem:[#allocation7 + $0x70] sm:$0xff]  ;;  %v139_v49 = vld [vmem:[#allocation7 + $0x78] sm:$0xff] }
  0x65   :  { %1694 = vmatpush3.bf16.msra.mxu0 %v1691_v8  ;;  %1722 = vmatpush3.bf16.msra.mxu1 %v1719_v20  ;;  %v2164_v50 = vld [vmem:[#allocation5 + $0x18] sm:$0xff]  ;;  %v1743_v51 = vpack.c.bf16 %v139_v49, %v138_v48  ;;  %v2166_v52 = vld [vmem:[#allocation5 + $0x20] sm:$0xff]  ;;  %v2170_v53 = vld [vmem:[#allocation5 + $0x28] sm:$0xff] }
  0x66   :  { %1696 = vmatprep.subr.bf16.mxu0 %v1695_v12  ;;  %1724 = vmatprep.subr.bf16.mxu1 %v1723_v26  ;;  %v2172_v54 = vld [vmem:[#allocation5 + $0x30] sm:$0xff]  ;;  %v2176_v55 = vld [vmem:[#allocation5 + $0x38] sm:$0xff]  ;;  %v2178_v56 = vld [vmem:[#allocation5 + $0x40] sm:$0xff] }
  0x67   :  { %v2182_v57 = vld [vmem:[#allocation5 + $0x48] sm:$0xff]  ;;  %v2184_v58 = vld [vmem:[#allocation5 + $0x50] sm:$0xff]  ;;  %v2188_v59 = vld [vmem:[#allocation5 + $0x58] sm:$0xff] }
  0x68   :  { %v2190_v60 = vld [vmem:[#allocation5 + $0x60] sm:$0xff]  ;;  %v2194_v61 = vld [vmem:[#allocation5 + $0x68] sm:$0xff]  ;;  %v2196_v62 = vld [vmem:[#allocation5 + $0x70] sm:$0xff] }
  0x69   :  { %1698 = vmatpush3.bf16.msra.mxu0 %v1695_v12  ;;  %1726 = vmatpush3.bf16.msra.mxu1 %v1723_v26  ;;  %v2200_v63 = vld [vmem:[#allocation5 + $0x78] sm:$0xff]  ;;  %v446_v17 = vld [vmem:[#allocation8] sm:$0xff]  ;;  %v447_v18 = vld [vmem:[#allocation8 + $0x8] sm:$0xff] }
  0x6a   :  { %1700 = vmatprep.subr.bf16.mxu0 %v1699_v21  ;;  %1728 = vmatprep.subr.bf16.mxu1 %v1727_v32  ;;  %v448_v19 = vld [vmem:[#allocation8 + $0x10] sm:$0xff]  ;;  %v1779_v20 = vpack.c.bf16 %v447_v18, %v446_v17  ;;  %v450_v23 = vld [vmem:[#allocation8 + $0x20] sm:$0xff]  ;;  %v451_v24 = vld [vmem:[#allocation8 + $0x28] sm:$0xff] }
  0x6b   :  { %v1787_v25 = vpack.c.bf16 %v451_v24, %v450_v23  ;;  %v452_v26 = vld [vmem:[#allocation8 + $0x30] sm:$0xff]  ;;  %v454_v29 = vld [vmem:[#allocation8 + $0x40] sm:$0xff]  ;;  %v455_v30 = vld [vmem:[#allocation8 + $0x48] sm:$0xff] }
  0x6c   :  { %v1795_v31 = vpack.c.bf16 %v455_v30, %v454_v29  ;;  %v458_v35 = vld [vmem:[#allocation8 + $0x60] sm:$0xff]  ;;  %v459_v36 = vld [vmem:[#allocation8 + $0x68] sm:$0xff] }
  0x6d   :  { %1702 = vmatpush3.bf16.msra.mxu0 %v1699_v21  ;;  %1730 = vmatpush3.bf16.msra.mxu1 %v1727_v32  ;;  %v449_v21 = vld [vmem:[#allocation8 + $0x18] sm:$0xff]  ;;  %v456_v32 = vld [vmem:[#allocation8 + $0x50] sm:$0xff]  ;;  %v1803_v37 = vpack.c.bf16 %v459_v36, %v458_v35 }
  0x6e   :  { %1704 = vmatprep.subr.bf16.mxu0 %v1703_v27  ;;  %1732 = vmatprep.subr.bf16.mxu1 %v1731_v38  ;;  %v1783_v22 = vpack.c.bf16 %v449_v21, %v448_v19 }
  0x71   :  { %1706 = vmatpush3.bf16.msra.mxu0 %v1703_v27  ;;  %1734 = vmatpush3.bf16.msra.mxu1 %v1731_v38  ;;  %v453_v27 = vld [vmem:[#allocation8 + $0x38] sm:$0xff]  ;;  %v460_v38 = vld [vmem:[#allocation8 + $0x70] sm:$0xff] }
  0x72   :  { %1708 = vmatprep.subr.bf16.mxu0 %v1707_v33  ;;  %1736 = vmatprep.subr.bf16.mxu1 %v1735_v42  ;;  %v1791_v28 = vpack.c.bf16 %v453_v27, %v452_v26 }
  0x75   :  { %1710 = vmatpush3.bf16.msra.mxu0 %v1707_v33  ;;  %1738 = vmatpush3.bf16.msra.mxu1 %v1735_v42  ;;  %v457_v33 = vld [vmem:[#allocation8 + $0x58] sm:$0xff] }
  0x76   :  { %1712 = vmatprep.subr.bf16.mxu0 %v1711_v39  ;;  %1740 = vmatprep.subr.bf16.mxu1 %v1739_v46  ;;  %v1799_v34 = vpack.c.bf16 %v457_v33, %v456_v32 }
  0x79   :  { %1714 = vmatpush3.bf16.msra.mxu0 %v1711_v39  ;;  %1742 = vmatpush3.bf16.msra.mxu1 %v1739_v46  ;;  %v461_v39 = vld [vmem:[#allocation8 + $0x78] sm:$0xff] }
  0x7a   :  { %1744 = vmatprep.subr.bf16.mxu1 %v1743_v51  ;;  %v1807_v40 = vpack.c.bf16 %v461_v39, %v460_v38 }
  0x7c   :  { %1380 = vmatmul.mubr.f32.vlgmr.msra.gmra.mrb[0].mxu0 %v2158_v45 }
  0x7d   :  { %1382 = vmatprep.mubr.f32.mxu0 %v2160_v47  ;;  %1746 = vmatpush3.bf16.msra.mxu1 %v1743_v51 }
  0x7e   :  { %1780 = vmatprep.subr.bf16.mxu1 %v1779_v20 }
  0x80   :  { %1383 = vmatmul.mubr.f32.gmra.mrb[2].mxu0 %v2164_v50 }
  0x81   :  { %1385 = vmatprep.mubr.f32.mxu0 %v2166_v52 }
  0x84   :  { %1386 = vmatmul.mubr.f32.gmra.mrb[4].mxu0 %v2170_v53 }
  0x85   :  { %1388 = vmatprep.mubr.f32.mxu0 %v2172_v54 }
  0x88   :  { %1389 = vmatmul.mubr.f32.gmra.mrb[6].mxu0 %v2176_v55 }
  0x89   :  { %1391 = vmatprep.mubr.f32.mxu0 %v2178_v56 }
  0x8c   :  { %1392 = vmatmul.mubr.f32.gmra.mrb[8].mxu0 %v2182_v57 }
  0x8d   :  { %1394 = vmatprep.mubr.f32.mxu0 %v2184_v58 }
  0x90   :  { %1395 = vmatmul.mubr.f32.gmra.mrb[10].mxu0 %v2188_v59 }
  0x91   :  { %1397 = vmatprep.mubr.f32.mxu0 %v2190_v60 }
  0x94   :  { %1398 = vmatmul.mubr.f32.gmra.mrb[12].mxu0 %v2194_v61 }
  0x95   :  { %1400 = vmatprep.mubr.f32.mxu0 %v2196_v62 }
  0x98   :  { %1401 = vmatmul.mubr.f32.gmra.mrb[14].mxu0 %v2200_v63 }
  0x99   :  { %1491 = vmatprep.mubr.f32.mxu0 %v2155_v9 }
 0x14f   :  { %v1381_v0 = vpop.f32.mrb[0].mxu0 }
 0x150   :  { %v206_v1 = vpop.f32.mrb[1].mxu0 }
 0x151   :  { %1435 = vmatprep.mubr.f32.mxu1 %v206_v1 }
 0x152   :  { %1436 = vmatmul.mubr.f32.vlgmr.msra.gmra.mrb[0].mxu1 %v1381_v0 }
 0x153   :  { %v1384_v2 = vpop.f32.mrb[2].mxu0  ;;  %1782 = vmatpush3.bf16.msra.mxu1 %v1779_v20 }
 0x154   :  { %v216_v3 = vpop.f32.mrb[3].mxu0  ;;  %1784 = vmatprep.subr.bf16.mxu1 %v1783_v22 }
 0x155   :  { %1438 = vmatprep.mubr.f32.mxu1 %v216_v3 }
 0x156   :  { %1439 = vmatmul.mubr.f32.gmra.mrb[2].mxu1 %v1384_v2 }
 0x157   :  { %v1387_v4 = vpop.f32.mrb[4].mxu0  ;;  %1786 = vmatpush3.bf16.msra.mxu1 %v1783_v22 }
 0x158   :  { %v226_v5 = vpop.f32.mrb[5].mxu0  ;;  %1788 = vmatprep.subr.bf16.mxu1 %v1787_v25 }
 0x159   :  { %1441 = vmatprep.mubr.f32.mxu1 %v226_v5 }
 0x15a   :  { %1442 = vmatmul.mubr.f32.gmra.mrb[4].mxu1 %v1387_v4 }
 0x15b   :  { %v1390_v6 = vpop.f32.mrb[6].mxu0  ;;  %1790 = vmatpush3.bf16.msra.mxu1 %v1787_v25 }
 0x15c   :  { %v236_v7 = vpop.f32.mrb[7].mxu0  ;;  %1792 = vmatprep.subr.bf16.mxu1 %v1791_v28 }
 0x15d   :  { %1444 = vmatprep.mubr.f32.mxu1 %v236_v7 }
 0x15e   :  { %1445 = vmatmul.mubr.f32.gmra.mrb[6].mxu1 %v1390_v6 }
 0x15f   :  { %v1393_v8 = vpop.f32.mrb[8].mxu0  ;;  %1794 = vmatpush3.bf16.msra.mxu1 %v1791_v28 }
 0x160   :  { %v246_v10 = vpop.f32.mrb[9].mxu0  ;;  %1796 = vmatprep.subr.bf16.mxu1 %v1795_v31 }
 0x161   :  { %1447 = vmatprep.mubr.f32.mxu1 %v246_v10 }
 0x162   :  { %1448 = vmatmul.mubr.f32.gmra.mrb[8].mxu1 %v1393_v8 }
 0x163   :  { %v1396_v11 = vpop.f32.mrb[10].mxu0  ;;  %1798 = vmatpush3.bf16.msra.mxu1 %v1795_v31 }
 0x164   :  { %v256_v12 = vpop.f32.mrb[11].mxu0  ;;  %1800 = vmatprep.subr.bf16.mxu1 %v1799_v34 }
 0x165   :  { %1450 = vmatprep.mubr.f32.mxu1 %v256_v12 }
 0x166   :  { %1451 = vmatmul.mubr.f32.gmra.mrb[10].mxu1 %v1396_v11 }
 0x167   :  { %v1399_v13 = vpop.f32.mrb[12].mxu0  ;;  %1802 = vmatpush3.bf16.msra.mxu1 %v1799_v34 }
 0x168   :  { %v266_v14 = vpop.f32.mrb[13].mxu0  ;;  %1804 = vmatprep.subr.bf16.mxu1 %v1803_v37 }
 0x169   :  { %1453 = vmatprep.mubr.f32.mxu1 %v266_v14 }
 0x16a   :  { %1454 = vmatmul.mubr.f32.gmra.mrb[12].mxu1 %v1399_v13 }
 0x16b   :  { %v1402_v15 = vpop.f32.mrb[14].mxu0  ;;  %1806 = vmatpush3.bf16.msra.mxu1 %v1803_v37 }
 0x16c   :  { %v276_v16 = vpop.f32.mrb[15].mxu0  ;;  %1808 = vmatprep.subr.bf16.mxu1 %v1807_v40 }
 0x16d   :  { %1456 = vmatprep.mubr.f32.mxu1 %v276_v16 }
 0x16e   :  { %1457 = vmatmul.mubr.f32.gmra.mrb[14].mxu1 %v1402_v15 }
 0x16f   :  { %1810 = vmatpush3.bf16.msra.mxu1 %v1807_v40 }
 0x225   :  { %v1437_v41 = vpop.f32.mrb[0].mxu1 }
 0x226   :  { %v431_v42 = vmax.f32 %v1437_v41, 0.0  ;;  %v351_v43 = vpop.f32.mrb[1].mxu1 }
 0x227   :  { %v430_v44 = vmax.f32 %v351_v43, 0.0 }
 0x229   :  { %v1747_v46 = vpack.c.bf16 %v431_v42, %v430_v44  ;;  %v1440_v48 = vpop.f32.mrb[2].mxu1 }
 0x22a   :  { %v433_v49 = vmax.f32 %v1440_v48, 0.0  ;;  %v361_v51 = vpop.f32.mrb[3].mxu1 }
 0x22b   :  { %v432_v0 = vmax.f32 %v361_v51, 0.0  ;;  %1748 = vmatprep.subr.bf16.mxu0 %v1747_v46 }
 0x22c   :  { %1750 = vmatpush3.bf16.msra.mxu0 %v1747_v46 }
 0x22d   :  { %v1751_v1 = vpack.c.bf16 %v433_v49, %v432_v0  ;;  %v1443_v2 = vpop.f32.mrb[4].mxu1  ;;  %v806_v0 = vld [vmem:[#allocation10] sm:$0xff] }
 0x22e   :  { %v435_v3 = vmax.f32 %v1443_v2, 0.0  ;;  %v371_v4 = vpop.f32.mrb[5].mxu1 }
 0x22f   :  { %v434_v5 = vmax.f32 %v371_v4, 0.0  ;;  %1752 = vmatprep.subr.bf16.mxu0 %v1751_v1  ;;  %v809_v4 = vld [vmem:[#allocation10 + $0x18] sm:$0xff] }
 0x230   :  { %1754 = vmatpush3.bf16.msra.mxu0 %v1751_v1  ;;  %v807_v1 = vld [vmem:[#allocation10 + $0x8] sm:$0xff] }
 0x231   :  { %v1755_v6 = vpack.c.bf16 %v435_v3, %v434_v5  ;;  %v1446_v7 = vpop.f32.mrb[6].mxu1  ;;  %v1811_v2 = vpack.c.bf16 %v807_v1, %v806_v0  ;;  %v808_v3 = vld [vmem:[#allocation10 + $0x10] sm:$0xff] }
 0x232   :  { %v437_v8 = vmax.f32 %v1446_v7, 0.0  ;;  %v381_v10 = vpop.f32.mrb[7].mxu1  ;;  %v1815_v5 = vpack.c.bf16 %v809_v4, %v808_v3  ;;  %v811_v7 = vld [vmem:[#allocation10 + $0x28] sm:$0xff] }
 0x233   :  { %v436_v11 = vmax.f32 %v381_v10, 0.0  ;;  %1756 = vmatprep.subr.bf16.mxu0 %v1755_v6  ;;  %v812_v10 = vld [vmem:[#allocation10 + $0x30] sm:$0xff] }
 0x234   :  { %1758 = vmatpush3.bf16.msra.mxu0 %v1755_v6  ;;  %v810_v6 = vld [vmem:[#allocation10 + $0x20] sm:$0xff] }
 0x235   :  { %v1759_v12 = vpack.c.bf16 %v437_v8, %v436_v11  ;;  %v1449_v13 = vpop.f32.mrb[8].mxu1  ;;  %v1819_v8 = vpack.c.bf16 %v811_v7, %v810_v6  ;;  %v813_v11 = vld [vmem:[#allocation10 + $0x38] sm:$0xff] }
 0x236   :  { %v439_v14 = vmax.f32 %v1449_v13, 0.0  ;;  %v391_v15 = vpop.f32.mrb[9].mxu1  ;;  %v815_v13 = vld [vmem:[#allocation10 + $0x48] sm:$0xff] }
 0x237   :  { %v438_v16 = vmax.f32 %v391_v15, 0.0  ;;  %1760 = vmatprep.subr.bf16.mxu0 %v1759_v12  ;;  %v816_v15 = vld [vmem:[#allocation10 + $0x50] sm:$0xff] }
 0x238   :  { %1762 = vmatpush3.bf16.msra.mxu0 %v1759_v12  ;;  %v1823_v12 = vpack.c.bf16 %v813_v11, %v812_v10 }
 0x239   :  { %v1763_v17 = vpack.c.bf16 %v439_v14, %v438_v16  ;;  %v1452_v18 = vpop.f32.mrb[10].mxu1  ;;  %v817_v16 = vld [vmem:[#allocation10 + $0x58] sm:$0xff] }
 0x23a   :  { %v441_v19 = vmax.f32 %v1452_v18, 0.0  ;;  %v401_v20 = vpop.f32.mrb[11].mxu1  ;;  %v818_v18 = vld [vmem:[#allocation10 + $0x60] sm:$0xff] }
 0x23b   :  { %v440_v21 = vmax.f32 %v401_v20, 0.0  ;;  %1764 = vmatprep.subr.bf16.mxu0 %v1763_v17 }
 0x23c   :  { %1766 = vmatpush3.bf16.msra.mxu0 %v1763_v17  ;;  %v1831_v17 = vpack.c.bf16 %v817_v16, %v816_v15 }
 0x23d   :  { %v1767_v22 = vpack.c.bf16 %v441_v19, %v440_v21  ;;  %v1455_v23 = vpop.f32.mrb[12].mxu1  ;;  %v819_v19 = vld [vmem:[#allocation10 + $0x68] sm:$0xff]  ;;  %v820_v21 = vld [vmem:[#allocation10 + $0x70] sm:$0xff] }
 0x23e   :  { %v443_v24 = vmax.f32 %v1455_v23, 0.0  ;;  %v411_v25 = vpop.f32.mrb[13].mxu1  ;;  %v1835_v20 = vpack.c.bf16 %v819_v19, %v818_v18 }
 0x23f   :  { %v442_v26 = vmax.f32 %v411_v25, 0.0  ;;  %1768 = vmatprep.subr.bf16.mxu0 %v1767_v22 }
 0x240   :  { %1770 = vmatpush3.bf16.msra.mxu0 %v1767_v22  ;;  %v821_v22 = vld [vmem:[#allocation10 + $0x78] sm:$0xff] }
 0x241   :  { %v1771_v27 = vpack.c.bf16 %v443_v24, %v442_v26  ;;  %v1458_v28 = vpop.f32.mrb[14].mxu1  ;;  %v1839_v23 = vpack.c.bf16 %v821_v22, %v820_v21 }
 0x242   :  { %v445_v29 = vmax.f32 %v1458_v28, 0.0  ;;  %v421_v30 = vpop.f32.mrb[15].mxu1 }
 0x243   :  { %v444_v31 = vmax.f32 %v421_v30, 0.0  ;;  %1772 = vmatprep.subr.bf16.mxu0 %v1771_v27 }
 0x244   :  { %1774 = vmatpush3.bf16.msra.mxu0 %v1771_v27 }
 0x245   :  { %v1775_v32 = vpack.c.bf16 %v445_v29, %v444_v31 }
 0x247   :  { %1776 = vmatprep.subr.bf16.mxu0 %v1775_v32 }
 0x248   :  { %1778 = vmatpush3.bf16.msra.mxu0 %v1775_v32 }
 0x249   :  { %1812 = vmatprep.subr.bf16.mxu0 %v1811_v2 }
 0x24b   :  { %1492 = vmatmul.mubr.f32.vlgmr.msra.gmra.mrb[16].mxu0 %v2158_v45 }
 0x24c   :  { %1494 = vmatprep.mubr.f32.mxu0 %v2160_v47  ;;  %1814 = vmatpush3.bf16.msra.mxu0 %v1811_v2 }
 0x24d   :  { %1816 = vmatprep.subr.bf16.mxu0 %v1815_v5 }
 0x24f   :  { %1495 = vmatmul.mubr.f32.gmra.mrb[18].mxu0 %v2164_v50 }
 0x250   :  { %1497 = vmatprep.mubr.f32.mxu0 %v2166_v52  ;;  %1818 = vmatpush3.bf16.msra.mxu0 %v1815_v5 }
 0x251   :  { %1820 = vmatprep.subr.bf16.mxu0 %v1819_v8 }
 0x253   :  { %1498 = vmatmul.mubr.f32.gmra.mrb[20].mxu0 %v2170_v53 }
 0x254   :  { %1500 = vmatprep.mubr.f32.mxu0 %v2172_v54  ;;  %1822 = vmatpush3.bf16.msra.mxu0 %v1819_v8 }
 0x255   :  { %1824 = vmatprep.subr.bf16.mxu0 %v1823_v12 }
 0x257   :  { %1501 = vmatmul.mubr.f32.gmra.mrb[22].mxu0 %v2176_v55 }
 0x258   :  { %1503 = vmatprep.mubr.f32.mxu0 %v2178_v56  ;;  %1826 = vmatpush3.bf16.msra.mxu0 %v1823_v12 }
 0x25b   :  { %1504 = vmatmul.mubr.f32.gmra.mrb[24].mxu0 %v2182_v57 }
 0x25c   :  { %1506 = vmatprep.mubr.f32.mxu0 %v2184_v58 }
 0x25f   :  { %1507 = vmatmul.mubr.f32.gmra.mrb[26].mxu0 %v2188_v59 }
 0x260   :  { %1509 = vmatprep.mubr.f32.mxu0 %v2190_v60 }
 0x263   :  { %1510 = vmatmul.mubr.f32.gmra.mrb[28].mxu0 %v2194_v61 }
 0x264   :  { %1512 = vmatprep.mubr.f32.mxu0 %v2196_v62 }
 0x267   :  { %1513 = vmatmul.mubr.f32.gmra.mrb[30].mxu0 %v2200_v63 }
 0x31e   :  { %v1493_v33 = vpop.f32.mrb[16].mxu0 }
 0x31f   :  { %v528_v34 = vpop.f32.mrb[17].mxu0 }
 0x320   :  { %1547 = vmatprep.mubr.f32.mxu1 %v528_v34 }
 0x321   :  { %1548 = vmatmul.mubr.f32.vlgmr.msra.gmra.mrb[16].mxu1 %v1493_v33 }
 0x322   :  { %v1496_v35 = vpop.f32.mrb[18].mxu0 }
 0x323   :  { %v538_v36 = vpop.f32.mrb[19].mxu0 }
 0x324   :  { %1550 = vmatprep.mubr.f32.mxu1 %v538_v36 }
 0x325   :  { %1551 = vmatmul.mubr.f32.gmra.mrb[18].mxu1 %v1496_v35 }
 0x326   :  { %v1499_v37 = vpop.f32.mrb[20].mxu0 }
 0x327   :  { %v548_v38 = vpop.f32.mrb[21].mxu0 }
 0x328   :  { %1553 = vmatprep.mubr.f32.mxu1 %v548_v38 }
 0x329   :  { %1554 = vmatmul.mubr.f32.gmra.mrb[20].mxu1 %v1499_v37 }
 0x32a   :  { %v1502_v39 = vpop.f32.mrb[22].mxu0 }
 0x32b   :  { %v558_v40 = vpop.f32.mrb[23].mxu0 }
 0x32c   :  { %1556 = vmatprep.mubr.f32.mxu1 %v558_v40 }
 0x32d   :  { %1557 = vmatmul.mubr.f32.gmra.mrb[22].mxu1 %v1502_v39 }
 0x32e   :  { %v1505_v41 = vpop.f32.mrb[24].mxu0 }
 0x32f   :  { %v568_v42 = vpop.f32.mrb[25].mxu0 }
 0x330   :  { %1559 = vmatprep.mubr.f32.mxu1 %v568_v42 }
 0x331   :  { %1560 = vmatmul.mubr.f32.gmra.mrb[24].mxu1 %v1505_v41 }
 0x332   :  { %v1508_v43 = vpop.f32.mrb[26].mxu0 }
 0x333   :  { %v578_v44 = vpop.f32.mrb[27].mxu0 }
 0x334   :  { %1562 = vmatprep.mubr.f32.mxu1 %v578_v44 }
 0x335   :  { %1563 = vmatmul.mubr.f32.gmra.mrb[26].mxu1 %v1508_v43 }
 0x336   :  { %v1511_v46 = vpop.f32.mrb[28].mxu0 }
 0x337   :  { %v588_v48 = vpop.f32.mrb[29].mxu0 }
 0x338   :  { %1565 = vmatprep.mubr.f32.mxu1 %v588_v48 }
 0x339   :  { %1566 = vmatmul.mubr.f32.gmra.mrb[28].mxu1 %v1511_v46 }
 0x33a   :  { %v1514_v49 = vpop.f32.mrb[30].mxu0 }
 0x33b   :  { %v598_v51 = vpop.f32.mrb[31].mxu0 }
 0x33c   :  { %1568 = vmatprep.mubr.f32.mxu1 %v598_v51 }
 0x33d   :  { %1569 = vmatmul.mubr.f32.gmra.mrb[30].mxu1 %v1514_v49 }
 0x33e   :  { %1659 = vmatprep.mubr.f32.mxu1 %v2155_v9  ;;  %v814_v9 = vld [vmem:[#allocation10 + $0x40] sm:$0xff] }
 0x33f   :  { %v1827_v14 = vpack.c.bf16 %v815_v13, %v814_v9 }
 0x341   :  { %1828 = vmatprep.subr.bf16.mxu0 %v1827_v14 }
 0x342   :  { %1830 = vmatpush3.bf16.msra.mxu0 %v1827_v14 }
 0x343   :  { %1832 = vmatprep.subr.bf16.mxu0 %v1831_v17 }
 0x346   :  { %1834 = vmatpush3.bf16.msra.mxu0 %v1831_v17 }
 0x347   :  { %1836 = vmatprep.subr.bf16.mxu0 %v1835_v20 }
 0x34a   :  { %1838 = vmatpush3.bf16.msra.mxu0 %v1835_v20 }
 0x34b   :  { %1840 = vmatprep.subr.bf16.mxu0 %v1839_v23 }
 0x34e   :  { %1842 = vmatpush3.bf16.msra.mxu0 %v1839_v23 }
 0x3f4   :  { %v1549_v24 = vpop.f32.mrb[16].mxu1 }
 0x3f5   :  { %v753_v25 = vmax.f32 %v1549_v24, 0.0  ;;  %v673_v26 = vpop.f32.mrb[17].mxu1 }
 0x3f6   :  { %v752_v27 = vmax.f32 %v673_v26, 0.0 }
 0x3f8   :  { %v768_v28 = vadd.f32 %v753_v25, %v752_v27  ;;  %v1552_v29 = vpop.f32.mrb[18].mxu1 }
 0x3f9   :  { %v683_v30 = vpop.f32.mrb[19].mxu1  ;;  %v755_v32 = vmax.f32 %v1552_v29, 0.0 }
 0x3fa   :  { %v754_v31 = vmax.f32 %v683_v30, 0.0 }
 0x3fc   :  { %v769_v33 = vadd.f32 %v768_v28, %v754_v31  ;;  %v1555_v34 = vpop.f32.mrb[20].mxu1 }
 0x3fd   :  { %v693_v35 = vpop.f32.mrb[21].mxu1  ;;  %v757_v38 = vmax.f32 %v1555_v34, 0.0 }
 0x3fe   :  { %v756_v36 = vmax.f32 %v693_v35, 0.0  ;;  %v770_v37 = vadd.f32 %v769_v33, %v755_v32 }
 0x400   :  { %v771_v39 = vadd.f32 %v770_v37, %v756_v36  ;;  %v1558_v40 = vpop.f32.mrb[22].mxu1 }
 0x401   :  { %v703_v41 = vpop.f32.mrb[23].mxu1  ;;  %v759_v44 = vmax.f32 %v1558_v40, 0.0 }
 0x402   :  { %v758_v42 = vmax.f32 %v703_v41, 0.0  ;;  %v772_v43 = vadd.f32 %v771_v39, %v757_v38 }
 0x404   :  { %v773_v46 = vadd.f32 %v772_v43, %v758_v42  ;;  %v1561_v48 = vpop.f32.mrb[24].mxu1 }
 0x405   :  { %v713_v49 = vpop.f32.mrb[25].mxu1  ;;  %v761_v1 = vmax.f32 %v1561_v48, 0.0 }
 0x406   :  { %v760_v51 = vmax.f32 %v713_v49, 0.0  ;;  %v774_v0 = vadd.f32 %v773_v46, %v759_v44 }
 0x408   :  { %v775_v2 = vadd.f32 %v774_v0, %v760_v51  ;;  %v1564_v3 = vpop.f32.mrb[26].mxu1 }
 0x409   :  { %v723_v4 = vpop.f32.mrb[27].mxu1  ;;  %v763_v7 = vmax.f32 %v1564_v3, 0.0 }
 0x40a   :  { %v762_v5 = vmax.f32 %v723_v4, 0.0  ;;  %v776_v6 = vadd.f32 %v775_v2, %v761_v1 }
 0x40c   :  { %v777_v8 = vadd.f32 %v776_v6, %v762_v5  ;;  %v1567_v10 = vpop.f32.mrb[28].mxu1 }
 0x40d   :  { %v733_v11 = vpop.f32.mrb[29].mxu1  ;;  %v765_v13 = vmax.f32 %v1567_v10, 0.0 }
 0x40e   :  { %v764_v12 = vmax.f32 %v733_v11, 0.0  ;;  %v778_v9 = vadd.f32 %v777_v8, %v763_v7 }
 0x410   :  { %v779_v14 = vadd.f32 %v778_v9, %v764_v12  ;;  %v1570_v15 = vpop.f32.mrb[30].mxu1 }
 0x411   :  { %v743_v16 = vpop.f32.mrb[31].mxu1  ;;  %v767_v19 = vmax.f32 %v1570_v15, 0.0 }
 0x412   :  { %v766_v17 = vmax.f32 %v743_v16, 0.0  ;;  %v780_v18 = vadd.f32 %v779_v14, %v765_v13 }
 0x414   :  { %v781_v20 = vadd.f32 %v780_v18, %v766_v17 }
 0x416   :  { %v782_v21 = vadd.f32 %v781_v20, %v767_v19 }
 0x418   :  { %v783_v22 = vrot.slane %v782_v21, 4 }
 0x41a   :  { %v784_v23 = vadd.f32 %v783_v22, %v782_v21 }
 0x41c   :  { %v785_v24 = vrot.slane %v784_v23, 2 }
 0x41e   :  { %v786_v26 = vadd.f32 %v785_v24, %v784_v23 }
 0x420   :  { %v787_v28 = vrot.slane %v786_v26, 1 }
 0x422   :  { %v788_v29 = vadd.f32 %v787_v28, %v786_v26 }
 0x424   :  { %v789_v30 = vmul.f32 0.03125, %v788_v29 }
 0x426   :  { %v804_v33 = vadd.f32 %v789_v30, %v766_v17  ;;  %v790_v34 = vadd.f32 %v789_v30, %v752_v27  ;;  %v791_v35 = vadd.f32 %v789_v30, %v753_v25  ;;  %v792_v37 = vadd.f32 %v789_v30, %v754_v31 }
 0x427   :  { %v793_v39 = vadd.f32 %v789_v30, %v755_v32  ;;  %v794_v40 = vadd.f32 %v789_v30, %v756_v36  ;;  %v795_v41 = vadd.f32 %v789_v30, %v757_v38  ;;  %v796_v43 = vadd.f32 %v789_v30, %v758_v42 }
 0x428   :  { %1603 = vmatprep.mubr.f32.mxu0 %v790_v34  ;;  %v797_v46 = vadd.f32 %v789_v30, %v759_v44  ;;  %v798_v48 = vadd.f32 %v789_v30, %v760_v51  ;;  %v799_v49 = vadd.f32 %v789_v30, %v761_v1  ;;  %v800_v0 = vadd.f32 %v789_v30, %v762_v5 }
 0x429   :  { %1604 = vmatmul.mubr.f32.vlgmr.msra.gmra.mrb[32].mxu0 %v791_v35  ;;  %v801_v2 = vadd.f32 %v789_v30, %v763_v7  ;;  %v802_v3 = vadd.f32 %v789_v30, %v764_v12  ;;  %v803_v4 = vadd.f32 %v789_v30, %v765_v13  ;;  %v805_v6 = vadd.f32 %v789_v30, %v767_v19 }
 0x42a   :  { %1606 = vmatprep.mubr.f32.mxu0 %v792_v37 }
 0x42d   :  { %1607 = vmatmul.mubr.f32.gmra.mrb[34].mxu0 %v793_v39 }
 0x42e   :  { %1609 = vmatprep.mubr.f32.mxu0 %v794_v40 }
 0x431   :  { %1610 = vmatmul.mubr.f32.gmra.mrb[36].mxu0 %v795_v41 }
 0x432   :  { %1612 = vmatprep.mubr.f32.mxu0 %v796_v43 }
 0x435   :  { %1613 = vmatmul.mubr.f32.gmra.mrb[38].mxu0 %v797_v46 }
 0x436   :  { %1615 = vmatprep.mubr.f32.mxu0 %v798_v48 }
 0x439   :  { %1616 = vmatmul.mubr.f32.gmra.mrb[40].mxu0 %v799_v49 }
 0x43a   :  { %1618 = vmatprep.mubr.f32.mxu0 %v800_v0 }
 0x43d   :  { %1619 = vmatmul.mubr.f32.gmra.mrb[42].mxu0 %v801_v2 }
 0x43e   :  { %1621 = vmatprep.mubr.f32.mxu0 %v802_v3 }
 0x441   :  { %1622 = vmatmul.mubr.f32.gmra.mrb[44].mxu0 %v803_v4 }
 0x442   :  { %1624 = vmatprep.mubr.f32.mxu0 %v804_v33 }
 0x445   :  { %1625 = vmatmul.mubr.f32.gmra.mrb[46].mxu0 %v805_v6 }
 0x4fc   :  { %v1605_v25 = vpop.f32.mrb[32].mxu0 }
 0x4fd   :  { %v888_v27 = vpop.f32.mrb[33].mxu0 }
 0x4fe   :  { %v1843_v31 = vpack.c.bf16 %v1605_v25, %v888_v27 }
 0x500   :  { %v1608_v32 = vpop.f32.mrb[34].mxu0  ;;  %1844 = vmatprep.subr.bf16.mxu1 %v1843_v31 }
 0x501   :  { %v898_v36 = vpop.f32.mrb[35].mxu0  ;;  %1846 = vmatpush3.bf16.msra.mxu1 %v1843_v31 }
 0x502   :  { %v1847_v38 = vpack.c.bf16 %v1608_v32, %v898_v36 }
 0x504   :  { %v1611_v42 = vpop.f32.mrb[36].mxu0  ;;  %1848 = vmatprep.subr.bf16.mxu1 %v1847_v38 }
 0x505   :  { %v908_v44 = vpop.f32.mrb[37].mxu0  ;;  %1850 = vmatpush3.bf16.msra.mxu1 %v1847_v38 }
 0x506   :  { %v1851_v51 = vpack.c.bf16 %v1611_v42, %v908_v44 }
 0x508   :  { %v1614_v1 = vpop.f32.mrb[38].mxu0  ;;  %1852 = vmatprep.subr.bf16.mxu1 %v1851_v51 }
 0x509   :  { %v918_v5 = vpop.f32.mrb[39].mxu0  ;;  %1854 = vmatpush3.bf16.msra.mxu1 %v1851_v51 }
 0x50a   :  { %v1855_v7 = vpack.c.bf16 %v1614_v1, %v918_v5 }
 0x50c   :  { %v1617_v8 = vpop.f32.mrb[40].mxu0  ;;  %1856 = vmatprep.subr.bf16.mxu1 %v1855_v7 }
 0x50d   :  { %v928_v10 = vpop.f32.mrb[41].mxu0  ;;  %1858 = vmatpush3.bf16.msra.mxu1 %v1855_v7 }
 0x50e   :  { %v1859_v11 = vpack.c.bf16 %v1617_v8, %v928_v10 }
 0x510   :  { %v1620_v12 = vpop.f32.mrb[42].mxu0  ;;  %1860 = vmatprep.subr.bf16.mxu1 %v1859_v11 }
 0x511   :  { %v938_v9 = vpop.f32.mrb[43].mxu0  ;;  %1862 = vmatpush3.bf16.msra.mxu1 %v1859_v11 }
 0x512   :  { %v1863_v13 = vpack.c.bf16 %v1620_v12, %v938_v9 }
 0x514   :  { %v1623_v14 = vpop.f32.mrb[44].mxu0  ;;  %1864 = vmatprep.subr.bf16.mxu1 %v1863_v13 }
 0x515   :  { %v948_v15 = vpop.f32.mrb[45].mxu0  ;;  %1866 = vmatpush3.bf16.msra.mxu1 %v1863_v13 }
 0x516   :  { %v1867_v16 = vpack.c.bf16 %v1623_v14, %v948_v15 }
 0x518   :  { %v1626_v17 = vpop.f32.mrb[46].mxu0  ;;  %1868 = vmatprep.subr.bf16.mxu1 %v1867_v16 }
 0x519   :  { %v958_v18 = vpop.f32.mrb[47].mxu0  ;;  %1870 = vmatpush3.bf16.msra.mxu1 %v1867_v16 }
 0x51a   :  { %v1871_v19 = vpack.c.bf16 %v1626_v17, %v958_v18 }
 0x51c   :  { %1872 = vmatprep.subr.bf16.mxu1 %v1871_v19 }
 0x51d   :  { %1874 = vmatpush3.bf16.msra.mxu1 %v1871_v19 }
 0x520   :  { %1660 = vmatmul.mubr.f32.vlgmr.msra.gmra.mrb[32].mxu1 %v2158_v45  ;;  %v1154_v45 = vld [vmem:[%s2258_s5] ss:$0 sm:$0xff]  ;;  %s2030_s5 = smov [#allocation11]  }
 0x521   :  { %1662 = vmatprep.mubr.f32.mxu1 %v2160_v47  ;;  %s1140_s3 = sshll.u32 %s2030_s5, 4  ;;  %s1141_s3 = int_to_ptr.vmem [resolvable:$true] %s1140_s3 }
 0x522   :  { %s1993_s24 = scalar_lea.vmem %s1141_s3, 2048  ;;  %p1998_p13 = scmp.lt.s32.totalorder %s1141_s3, %s1141_s3 }
 0x523   :  { %p1994_p12 = scmp.ne.s32.totalorder %s1141_s3, %s1993_s24  ;;  %p1999_p0 = scmp.lt.s32.totalorder %s1993_s24, %s1993_s24 }
 0x524   :  { %1663 = vmatmul.mubr.f32.gmra.mrb[34].mxu1 %v2164_v50 }
 0x525   :  { %1665 = vmatprep.mubr.f32.mxu1 %v2166_v52  ;;  %p2000_p1 = por %p1999_p0, %p1998_p13 }
 0x527   :  { %p2001_p2 = pnand %p2000_p1, %p1994_p12 }
 0x528   :  { %1666 = vmatmul.mubr.f32.gmra.mrb[36].mxu1 %v2170_v53 }
 0x529   :  { %1668 = vmatprep.mubr.f32.mxu1 %v2172_v54 }
 0x52c   :  { %1669 = vmatmul.mubr.f32.gmra.mrb[38].mxu1 %v2176_v55 }
 0x52d   :  { %1671 = vmatprep.mubr.f32.mxu1 %v2178_v56 }
 0x530   :  { %1672 = vmatmul.mubr.f32.gmra.mrb[40].mxu1 %v2182_v57 }
 0x531   :  { %1674 = vmatprep.mubr.f32.mxu1 %v2184_v58 }
 0x534   :  { %1675 = vmatmul.mubr.f32.gmra.mrb[42].mxu1 %v2188_v59 }
 0x535   :  { %1677 = vmatprep.mubr.f32.mxu1 %v2190_v60 }
 0x538   :  { %1678 = vmatmul.mubr.f32.gmra.mrb[44].mxu1 %v2194_v61 }
 0x539   :  { %1680 = vmatprep.mubr.f32.mxu1 %v2196_v62 }
 0x53c   :  { %1681 = vmatmul.mubr.f32.gmra.mrb[46].mxu1 %v2200_v63 }
 0x5f3   :  { %v1661_v47 = vpop.f32.mrb[32].mxu1 }
 0x5f4   :  { %v1046_v50 = vadd.f32 %v1661_v47, %v1154_v45  ;;  %v1040_v52 = vpop.f32.mrb[33].mxu1 }
 0x5f5   :  { %v1041_v53 = vadd.f32 %v1154_v45, %v1040_v52 }
 0x5f6   :  { %1120 = vst [vmem:[#allocation11 + $0x8] sm:$0xff] %v1046_v50 }
 0x5f7   :  { %1119 = vst [vmem:[#allocation11] sm:$0xff] %v1041_v53  ;;  %v1664_v54 = vpop.f32.mrb[34].mxu1 }
 0x5f8   :  { %v1056_v55 = vadd.f32 %v1664_v54, %v1154_v45  ;;  %v1050_v56 = vpop.f32.mrb[35].mxu1 }
 0x5f9   :  { %v1051_v57 = vadd.f32 %v1154_v45, %v1050_v56 }
 0x5fa   :  { %1122 = vst [vmem:[#allocation11 + $0x18] sm:$0xff] %v1056_v55 }
 0x5fb   :  { %1121 = vst [vmem:[#allocation11 + $0x10] sm:$0xff] %v1051_v57  ;;  %v1667_v58 = vpop.f32.mrb[36].mxu1 }
 0x5fc   :  { %v1066_v59 = vadd.f32 %v1667_v58, %v1154_v45  ;;  %v1060_v60 = vpop.f32.mrb[37].mxu1 }
 0x5fd   :  { %v1061_v61 = vadd.f32 %v1154_v45, %v1060_v60 }
 0x5fe   :  { %1124 = vst [vmem:[#allocation11 + $0x28] sm:$0xff] %v1066_v59 }
 0x5ff   :  { %1123 = vst [vmem:[#allocation11 + $0x20] sm:$0xff] %v1061_v61  ;;  %v1670_v62 = vpop.f32.mrb[38].mxu1 }
 0x600   :  { %v1076_v63 = vadd.f32 %v1670_v62, %v1154_v45  ;;  %v1070_v20 = vpop.f32.mrb[39].mxu1 }
 0x601   :  { %v1071_v21 = vadd.f32 %v1154_v45, %v1070_v20 }
 0x602   :  { %1126 = vst [vmem:[#allocation11 + $0x38] sm:$0xff] %v1076_v63 }
 0x603   :  { %1125 = vst [vmem:[#allocation11 + $0x30] sm:$0xff] %v1071_v21  ;;  %v1673_v22 = vpop.f32.mrb[40].mxu1 }
 0x604   :  { %v1086_v23 = vadd.f32 %v1673_v22, %v1154_v45  ;;  %v1080_v24 = vpop.f32.mrb[41].mxu1 }
 0x605   :  { %v1081_v26 = vadd.f32 %v1154_v45, %v1080_v24 }
 0x606   :  { %1128 = vst [vmem:[#allocation11 + $0x48] sm:$0xff] %v1086_v23 }
 0x607   :  { %1127 = vst [vmem:[#allocation11 + $0x40] sm:$0xff] %v1081_v26  ;;  %v1676_v28 = vpop.f32.mrb[42].mxu1 }
 0x608   :  { %v1096_v29 = vadd.f32 %v1676_v28, %v1154_v45  ;;  %v1090_v30 = vpop.f32.mrb[43].mxu1 }
 0x609   :  { %v1091_v33 = vadd.f32 %v1154_v45, %v1090_v30 }
 0x60a   :  { %1130 = vst [vmem:[#allocation11 + $0x58] sm:$0xff] %v1096_v29 }
 0x60b   :  { %1129 = vst [vmem:[#allocation11 + $0x50] sm:$0xff] %v1091_v33  ;;  %v1679_v34 = vpop.f32.mrb[44].mxu1 }
 0x60c   :  { %v1106_v35 = vadd.f32 %v1679_v34, %v1154_v45  ;;  %v1100_v37 = vpop.f32.mrb[45].mxu1 }
 0x60d   :  { %v1101_v39 = vadd.f32 %v1154_v45, %v1100_v37 }
 0x60e   :  { %1132 = vst [vmem:[#allocation11 + $0x68] sm:$0xff] %v1106_v35 }
 0x60f   :  { %1131 = vst [vmem:[#allocation11 + $0x60] sm:$0xff] %v1101_v39  ;;  %v1682_v40 = vpop.f32.mrb[46].mxu1 }
 0x610   :  { %v1116_v41 = vadd.f32 %v1682_v40, %v1154_v45  ;;  %v1110_v43 = vpop.f32.mrb[47].mxu1 }
 0x611   :  { %v1111_v46 = vadd.f32 %v1154_v45, %v1110_v43 }
 0x612   :  { %1134 = vst [vmem:[#allocation11 + $0x78] sm:$0xff] %v1116_v41 }
 0x613   :  { %1133 = vst [vmem:[#allocation11 + $0x70] sm:$0xff] %v1111_v46 }
 0x614   :  { %2004 = shalt.err (!%p2001_p2)
}
 0x615   :  { %s2005_s14 = scalar_lea.hbm %s2259_s6, 2048 }
 0x616   :  { %p2006_p3 = scmp.ne.s32.totalorder %s2259_s6, %s2005_s14  ;;  %p2009_p4 = scmp.lt.u32.totalorder %s2005_s14, %s2259_s6 }
 0x618   :  { %p2011_p5 = pnand %p2009_p4, %p2006_p3 }
 0x61a   :  { %2014 = shalt.err (!%p2011_p5)
}
 0x61b   :  { %1146 = dma.vmem_to_hbm [thread:$0]  %s1141_s3, 2048, %s2259_s6, [#allocation4], %s2025_s9, %s2025_s9, %s2026_s10  }
 0x61c   :  { %2021 = dma.done.wait [#allocation4], 2048  }
 0x61d   :  { %2022 = vsyncadd [#allocation4], 4294965248 }
 0x61e   :  { %1150 = vsyncpa [#allocation3], 1 }
 0x61f   :  { %1151 = vsyncpa [#allocation6], 1 }
 0x620   :  { %1152 = vsyncpa [#allocation9], 1 }
 0x621   :  { %1153 = vsyncpa [#allocation4], 1 }

</bundles_post_ra>
